<compile_context>
chip_gen: v5e
topology: v5e:2x2
jax: 0.10.0
libtpu: 0.0.40
codegen_flags: <defaults>
</compile_context>

<pallas_src>
import functools

import jax
import jax.numpy as jnp
from jax.experimental import pallas as pl
from jax.experimental.pallas import tpu as pltpu


_ROW_TILE = 2048                   # rows per grid step (sweepable, 8-aligned)
# 32 MiB scoped VMEM is safe on v5e/v6e/v7x; per-step usage here is ~2 MiB.
# (Raise towards 48 MiB only if tiles grow past ~8K rows; keep <= v7x budget.)
_VMEM_LIMIT = 32 * 1024 * 1024


# ------------------------------------------------------------------ helpers

def _round_up(x, m):
    return ((x + m - 1) // m) * m


def _choose_row_tile(e, row_tile):
    """Pick the per-step row tile.

    Large tiles amortize the ~0.35us/step grid overhead; but aim for >= 2
    grid steps so the "parallel" axis can shard across v7x's two TensorCores
    even on small graphs.
    """
    if e <= 8:
        return max(e, 1)                       # single full-array block
    half = _round_up((e + 1) // 2, 8)          # <= half the rows, 8-aligned
    return max(8, min(row_tile, half))


def _pack_params(layers, permute_last_gate=False):
    """Pack an MLP's weights (bf16) and biases (f32) into single arrays.

    Weights are stacked row-wise at 16-row-aligned offsets (bf16 sublane
    packing) and right-padded to a common lane width, so the kernel needs
    only two constant BlockSpecs and slices them statically.

    Returns (w_packed, b_packed, dims) where dims is a static tuple of
    (row_offset, d_in, d_out) per layer.
    """
    ws = [w for w, _ in layers]
    bs = [b for _, b in layers]
    if permute_last_gate:
        # Last layer emits [k | f1 | f2]; permute columns to [f1 | f2 | k] so
        # the gate kernel does one matmul and slices k/f in-register.
        ws[-1] = jnp.concatenate([ws[-1][:, 1:], ws[-1][:, :1]], axis=1)
        bs[-1] = jnp.concatenate([bs[-1][:, 1:], bs[-1][:, :1]], axis=1)

    wmax = max(w.shape[1] for w in ws)
    dims, rows = [], 0
    for w in ws:
        dims.append((rows, w.shape[0], w.shape[1]))
        rows += _round_up(w.shape[0], 16)

    w_packed = jnp.zeros((rows, wmax), jnp.bfloat16)
    for (off, din, dout), w in zip(dims, ws):
        w_packed = w_packed.at[off:off + din, :dout].set(w.astype(jnp.bfloat16))
    b_packed = jnp.zeros((len(bs), wmax), jnp.float32)
    for li, b in enumerate(bs):
        b_packed = b_packed.at[li, :b.shape[1]].set(b[0])
    return w_packed, b_packed, tuple(dims)


# ------------------------------------------------------------------ kernel

def _make_mlp_kernel(dims, gated):
    """MLP over one row tile.

    The three logical inputs are concatenated along lanes in-kernel and fed
    to a single first-layer matmul; each layer statically slices the packed
    weight/bias constants; LeakyReLU(0.2) between layers, none on the last.
    If `gated`, the last layer's columns are [f1 | f2 | k] and the kernel
    emits f * sigmoid(k) as one contiguous (tr, h1+h2) block.
    """
    n_layers = len(dims)

    def kernel(s_ref, d_ref, e_ref, w_ref, b_ref, o_ref):
        x = jnp.concatenate([s_ref[...], d_ref[...], e_ref[...]], axis=1)
        h = x.astype(jnp.bfloat16)
        for li, (off, din, dout) in enumerate(dims):
            w = w_ref[off:off + din, :dout]              # bf16 static slice
            b = b_ref[li:li + 1, :dout]                  # f32 static slice
            h = jnp.dot(h, w, preferred_element_type=jnp.float32) + b
            if li < n_layers - 1:
                h = jnp.where(h > 0, h, 0.2 * h).astype(jnp.bfloat16)
        if gated:
            o_ref[...] = h[:, :-1] * jax.nn.sigmoid(h[:, -1:])
        else:
            o_ref[...] = h

    return kernel


# ------------------------------------------------------------------ wrapper

def _run_edge_mlp(xs, layers, *, gated=False, gate_h=None, row_tile=_ROW_TILE):
    """Run an MLP over row-aligned inputs xs = (src_nf, dst_nf, ef).

    Inputs stay f32 in HBM (cast to bf16 in-kernel, no wrapper-side copies),
    rows are not padded (ragged last block handled by Pallas), outputs f32.
    Returns the MLP output, or (f1*sigmoid(k), f2*sigmoid(k)) when gated.
    """
    e = xs[0].shape[0]
    w_packed, b_packed, dims = _pack_params(layers, permute_last_gate=gated)
    dout_full = dims[-1][2]
    dout = dout_full - 1 if gated else dout_full

    if e == 0:  # degenerate: no edges of this type
        out = jnp.zeros((0, dout), jnp.float32)
        return (out[:, :gate_h], out[:, gate_h:]) if gated else out

    tr = _choose_row_tile(e, row_tile)
    grid = (pl.cdiv(e, tr),)

    in_specs = [pl.BlockSpec((tr, x.shape[1]), lambda i: (i, 0)) for x in xs]
    in_specs += [pl.BlockSpec(w_packed.shape, lambda i: (0, 0)),
                 pl.BlockSpec(b_packed.shape, lambda i: (0, 0))]

    out = pl.pallas_call(
        _make_mlp_kernel(dims, gated),
        out_shape=jax.ShapeDtypeStruct((e, dout), jnp.float32),
        grid=grid,
        in_specs=in_specs,
        out_specs=pl.BlockSpec((tr, dout), lambda i: (i, 0)),
        compiler_params=pltpu.CompilerParams(
            dimension_semantics=("parallel",),
            vmem_limit_bytes=_VMEM_LIMIT),
    )(*xs, w_packed, b_packed)

    if gated:
        return out[:, :gate_h], out[:, gate_h:]
    return out


# --------------------------------------------------------------- parameters

def init_mlp(key, sizes, scale=0.1):
    layers = []
    for i in range(1, len(sizes)):
        key, kw, kb = jax.random.split(key, 3)
        w = scale * jax.random.normal(kw, (sizes[i - 1], sizes[i]), jnp.float32)
        b = scale * jax.random.normal(kb, (1, sizes[i]), jnp.float32)
        layers.append((w, b))
    return layers


def init_netconv_params(key, in_nf, in_ef, out_nf, h1, h2, hidden):
    k1, k2, k3 = jax.random.split(key, 3)
    # MLP_msg_o2i: (2*in_nf+in_ef, H, H, H, H, out_nf)   -> 5 Linear layers
    o2i = init_mlp(k1, [2 * in_nf + in_ef, hidden, hidden, hidden, hidden, out_nf])
    # MLP_msg_i2o: (2*in_nf+in_ef, H, H, H, 1+h1+h2)     -> 4 Linear layers
    i2o = init_mlp(k2, [2 * in_nf + in_ef, hidden, hidden, hidden, 1 + h1 + h2])
    # MLP_reduce_o: (in_nf+h1+h2, H, H, H, out_nf)       -> 4 Linear layers
    red = init_mlp(k3, [in_nf + h1 + h2, hidden, hidden, hidden, out_nf])
    return {"o2i": o2i, "i2o": i2o, "reduce": red}


# ----------------------------------------------------------------- forward

@functools.partial(jax.jit, static_argnames=("num_nodes", "h1", "h2"))
def net_conv_forward(params, nf,
                     src_out, dst_out, ef_out,
                     src_in, dst_in, ef_in,
                     output_nodes, *, num_nodes, h1, h2):
    n = num_nodes

    # TODO(synk): the index gathers (nf[src], nf[dst], nfo*[output_nodes]) and
    # the segment_sum/segment_max scatter reductions are data-dependent and
    # stay in plain JAX; fusing them into the kernels (edges pre-sorted by
    # dst + PrefetchScalarGridSpec segment offsets, nf resident in VMEM) is
    # the remaining top-level HBM optimization.

    # ---- net_out: efi messages, sum-reduce into dst -> new_nf -------------
    efi = _run_edge_mlp((nf[src_out], nf[dst_out], ef_out),
                        params["o2i"])                         # [E_out, out_nf]
    new_nf = jax.ops.segment_sum(efi, dst_out, num_segments=n)

    # ---- net_in: gated messages, sum / max reduce --------------------------
    efo1, efo2 = _run_edge_mlp((nf[src_in], nf[dst_in], ef_in),
                               params["i2o"], gated=True, gate_h=h1)
    nfo1 = jax.ops.segment_sum(efo1, dst_in, num_segments=n)
    nfo2 = jax.ops.segment_max(efo2, dst_in, num_segments=n)
    # DGL fills zero-in-degree nodes with 0 for max reduce; segment_max fills
    # -inf.  Only replace exact -inf so genuine NaNs still surface.
    nfo2 = jnp.where(jnp.isneginf(nfo2), 0.0, nfo2)

    # ---- node_reduce_o on output nodes only --------------------------------
    new_out = _run_edge_mlp((nf[output_nodes], nfo1[output_nodes],
                             nfo2[output_nodes]),
                            params["reduce"])                  # [n_out, out_nf]
    new_nf = new_nf.at[output_nodes].set(new_out)
    return new_nf


# --------------------------------------------------------------------- main

if __name__ == "__main__":
    in_nf, in_ef, out_nf = 8, 4, 8
    h1 = h2 = 32
    hidden = 32          # Config.hidden_dim_netprop

    N, E_out, E_in, N_OUT = 12, 20, 20, 4

    key = jax.random.PRNGKey(0)
    ks = jax.random.split(key, 10)

    nf = jax.random.normal(ks[0], (N, in_nf), jnp.float32)
    ef_out = jax.random.normal(ks[1], (E_out, in_ef), jnp.float32)
    ef_in = jax.random.normal(ks[2], (E_in, in_ef), jnp.float32)
    src_out = jax.random.randint(ks[3], (E_out,), 0, N)
    dst_out = jax.random.randint(ks[4], (E_out,), 0, N)
    src_in = jax.random.randint(ks[5], (E_in,), 0, N)
    dst_in = jax.random.randint(ks[6], (E_in,), 0, N)
    output_nodes = jnp.arange(N_OUT, dtype=jnp.int32)

    params = init_netconv_params(ks[7], in_nf, in_ef, out_nf, h1, h2, hidden)

    new_nf = net_conv_forward(params, nf,
                              src_out, dst_out, ef_out,
                              src_in, dst_in, ef_in,
                              output_nodes, num_nodes=N, h1=h1, h2=h2)
    jax.block_until_ready(new_nf)
    assert new_nf.shape == (N, out_nf)
    assert bool(jnp.all(jnp.isfinite(new_nf)))
    # TODO(synk): dropout is treated as identity (eval mode).
    print("KERNEL_OK")
</pallas_src>

<mosaic_0001>
module attributes {stable_mosaic.version = 11 : i64} {
  func.func @kernel(%arg0: i32, %arg1: memref<16x8xf32, #tpu.memory_space<vmem>>, %arg2: memref<16x8xf32, #tpu.memory_space<vmem>>, %arg3: memref<16x4xf32, #tpu.memory_space<vmem>>, %arg4: memref<128x65xbf16, #tpu.memory_space<vmem>>, %arg5: memref<4x65xf32, #tpu.memory_space<vmem>>, %arg6: memref<16x64xf32, #tpu.memory_space<vmem>>) attributes {dimension_semantics = [#tpu.dimension_semantics<parallel>], iteration_bounds = array<i64: 2>, scalar_prefetch = 0 : i64, scratch_operands = 0 : i64, tpu.core_type = #tpu.core_type<tc>, window_params = [{transform_indices = @transform_0, window_bounds = array<i64: 16, 8>}, {transform_indices = @transform_1, window_bounds = array<i64: 16, 8>}, {transform_indices = @transform_2, window_bounds = array<i64: 16, 4>}, {pipeline_mode = #tpu.pipeline_mode<synchronous>, transform_indices = @transform_3, window_bounds = array<i64: 128, 65>}, {pipeline_mode = #tpu.pipeline_mode<synchronous>, transform_indices = @transform_4, window_bounds = array<i64: 4, 65>}, {transform_indices = @transform_5, window_bounds = array<i64: 16, 64>}]} {
    %c0 = arith.constant 0 : index
    %c0_0 = arith.constant 0 : index
    %0 = vector.load %arg1[%c0, %c0_0] : memref<16x8xf32, #tpu.memory_space<vmem>>, vector<16x8xf32>
    %c0_1 = arith.constant 0 : index
    %c0_2 = arith.constant 0 : index
    %1 = vector.load %arg2[%c0_1, %c0_2] : memref<16x8xf32, #tpu.memory_space<vmem>>, vector<16x8xf32>
    %c0_3 = arith.constant 0 : index
    %c0_4 = arith.constant 0 : index
    %2 = vector.load %arg3[%c0_3, %c0_4] : memref<16x4xf32, #tpu.memory_space<vmem>>, vector<16x4xf32>
    %3 = tpu.concatenate %0, %1, %2 in 1 : vector<16x8xf32>, vector<16x8xf32>, vector<16x4xf32> -> vector<16x20xf32>
    %4 = arith.truncf %3 : vector<16x20xf32> to vector<16x20xbf16>
    %c0_5 = arith.constant 0 : index
    %c0_6 = arith.constant 0 : index
    %5 = vector.load %arg4[%c0_5, %c0_6] : memref<128x65xbf16, #tpu.memory_space<vmem>>, vector<20x32xbf16>
    %c0_7 = arith.constant 0 : index
    %c0_8 = arith.constant 0 : index
    %6 = vector.load %arg5[%c0_7, %c0_8] : memref<4x65xf32, #tpu.memory_space<vmem>>, vector<1x32xf32>
    %cst = arith.constant dense<0.000000e+00> : vector<16x32xf32>
    %7 = tpu.matmul %4, %5, %cst {dimension_numbers = #tpu.dot_dimension_numbers<[1], [0], [0], [1], [0, 0, 1, 1], [], []>} : vector<16x20xbf16>, vector<20x32xbf16>, vector<16x32xf32> -> vector<16x32xf32>
    %8 = vector.broadcast %6 : vector<1x32xf32> to vector<16x32xf32>
    %9 = arith.addf %7, %8 : vector<16x32xf32>
    %cst_9 = arith.constant 0.000000e+00 : f32
    %10 = vector.broadcast %cst_9 : f32 to vector<16x32xf32>
    %11 = arith.cmpf ogt, %9, %10 : vector<16x32xf32>
    %cst_10 = arith.constant 2.000000e-01 : f32
    %12 = vector.broadcast %cst_10 : f32 to vector<16x32xf32>
    %13 = arith.mulf %12, %9 : vector<16x32xf32>
    %14 = arith.select %11, %9, %13 : vector<16x32xi1>, vector<16x32xf32>
    %15 = arith.truncf %14 : vector<16x32xf32> to vector<16x32xbf16>
    %c32 = arith.constant 32 : index
    %c0_11 = arith.constant 0 : index
    %16 = vector.load %arg4[%c32, %c0_11] : memref<128x65xbf16, #tpu.memory_space<vmem>>, vector<32x32xbf16>
    %c1 = arith.constant 1 : index
    %c0_12 = arith.constant 0 : index
    %17 = vector.load %arg5[%c1, %c0_12] : memref<4x65xf32, #tpu.memory_space<vmem>>, vector<1x32xf32>
    %cst_13 = arith.constant dense<0.000000e+00> : vector<16x32xf32>
    %18 = tpu.matmul %15, %16, %cst_13 {dimension_numbers = #tpu.dot_dimension_numbers<[1], [0], [0], [1], [0, 0, 1, 1], [], []>} : vector<16x32xbf16>, vector<32x32xbf16>, vector<16x32xf32> -> vector<16x32xf32>
    %19 = vector.broadcast %17 : vector<1x32xf32> to vector<16x32xf32>
    %20 = arith.addf %18, %19 : vector<16x32xf32>
    %cst_14 = arith.constant 0.000000e+00 : f32
    %21 = vector.broadcast %cst_14 : f32 to vector<16x32xf32>
    %22 = arith.cmpf ogt, %20, %21 : vector<16x32xf32>
    %cst_15 = arith.constant 2.000000e-01 : f32
    %23 = vector.broadcast %cst_15 : f32 to vector<16x32xf32>
    %24 = arith.mulf %23, %20 : vector<16x32xf32>
    %25 = arith.select %22, %20, %24 : vector<16x32xi1>, vector<16x32xf32>
    %26 = arith.truncf %25 : vector<16x32xf32> to vector<16x32xbf16>
    %c64 = arith.constant 64 : index
    %c0_16 = arith.constant 0 : index
    %27 = vector.load %arg4[%c64, %c0_16] : memref<128x65xbf16, #tpu.memory_space<vmem>>, vector<32x32xbf16>
    %c2 = arith.constant 2 : index
    %c0_17 = arith.constant 0 : index
    %28 = vector.load %arg5[%c2, %c0_17] : memref<4x65xf32, #tpu.memory_space<vmem>>, vector<1x32xf32>
    %cst_18 = arith.constant dense<0.000000e+00> : vector<16x32xf32>
    %29 = tpu.matmul %26, %27, %cst_18 {dimension_numbers = #tpu.dot_dimension_numbers<[1], [0], [0], [1], [0, 0, 1, 1], [], []>} : vector<16x32xbf16>, vector<32x32xbf16>, vector<16x32xf32> -> vector<16x32xf32>
    %30 = vector.broadcast %28 : vector<1x32xf32> to vector<16x32xf32>
    %31 = arith.addf %29, %30 : vector<16x32xf32>
    %cst_19 = arith.constant 0.000000e+00 : f32
    %32 = vector.broadcast %cst_19 : f32 to vector<16x32xf32>
    %33 = arith.cmpf ogt, %31, %32 : vector<16x32xf32>
    %cst_20 = arith.constant 2.000000e-01 : f32
    %34 = vector.broadcast %cst_20 : f32 to vector<16x32xf32>
    %35 = arith.mulf %34, %31 : vector<16x32xf32>
    %36 = arith.select %33, %31, %35 : vector<16x32xi1>, vector<16x32xf32>
    %37 = arith.truncf %36 : vector<16x32xf32> to vector<16x32xbf16>
    %c96 = arith.constant 96 : index
    %c0_21 = arith.constant 0 : index
    %38 = vector.load %arg4[%c96, %c0_21] : memref<128x65xbf16, #tpu.memory_space<vmem>>, vector<32x65xbf16>
    %c3 = arith.constant 3 : index
    %c0_22 = arith.constant 0 : index
    %39 = vector.load %arg5[%c3, %c0_22] : memref<4x65xf32, #tpu.memory_space<vmem>>, vector<1x65xf32>
    %cst_23 = arith.constant dense<0.000000e+00> : vector<16x65xf32>
    %40 = tpu.matmul %37, %38, %cst_23 {dimension_numbers = #tpu.dot_dimension_numbers<[1], [0], [0], [1], [0, 0, 1, 1], [], []>} : vector<16x32xbf16>, vector<32x65xbf16>, vector<16x65xf32> -> vector<16x65xf32>
    %41 = vector.broadcast %39 : vector<1x65xf32> to vector<16x65xf32>
    %42 = arith.addf %40, %41 : vector<16x65xf32>
    %43 = vector.extract_strided_slice %42 {offsets = [0, 0], sizes = [16, 64], strides = [1, 1]} : vector<16x65xf32> to vector<16x64xf32>
    %44 = vector.extract_strided_slice %42 {offsets = [0, 64], sizes = [16, 1], strides = [1, 1]} : vector<16x65xf32> to vector<16x1xf32>
    %45 = arith.negf %44 : vector<16x1xf32>
    %46 = math.exp %45 : vector<16x1xf32>
    %cst_24 = arith.constant 1.000000e+00 : f32
    %47 = vector.broadcast %cst_24 : f32 to vector<16x1xf32>
    %48 = arith.addf %47, %46 : vector<16x1xf32>
    %49 = arith.divf %47, %48 : vector<16x1xf32>
    %50 = vector.broadcast %49 : vector<16x1xf32> to vector<16x64xf32>
    %51 = arith.mulf %43, %50 : vector<16x64xf32>
    %c0_25 = arith.constant 0 : index
    %c0_26 = arith.constant 0 : index
    %52 = vector.load %arg6[%c0_25, %c0_26] : memref<16x64xf32, #tpu.memory_space<vmem>>, vector<16x64xf32>
    tpu.vector_store %arg6[%c0_25, %c0_26], %51 {strides = array<i32>} : memref<16x64xf32, #tpu.memory_space<vmem>>, vector<16x64xf32>,
    return
  }
  func.func @transform_0(%arg0: i32) -> (i32, i32) {
    %c0_i32 = arith.constant 0 : i32
    %c0_i32_0 = arith.constant 0 : i32
    return %arg0, %c0_i32 : i32, i32
  }
  func.func @transform_1(%arg0: i32) -> (i32, i32) {
    %c0_i32 = arith.constant 0 : i32
    %c0_i32_0 = arith.constant 0 : i32
    return %arg0, %c0_i32 : i32, i32
  }
  func.func @transform_2(%arg0: i32) -> (i32, i32) {
    %c0_i32 = arith.constant 0 : i32
    %c0_i32_0 = arith.constant 0 : i32
    return %arg0, %c0_i32 : i32, i32
  }
  func.func @transform_3(%arg0: i32) -> (i32, i32) {
    %c0_i32 = arith.constant 0 : i32
    %c0_i32_0 = arith.constant 0 : i32
    %c0_i32_1 = arith.constant 0 : i32
    return %c0_i32, %c0_i32_0 : i32, i32
  }
  func.func @transform_4(%arg0: i32) -> (i32, i32) {
    %c0_i32 = arith.constant 0 : i32
    %c0_i32_0 = arith.constant 0 : i32
    %c0_i32_1 = arith.constant 0 : i32
    return %c0_i32, %c0_i32_0 : i32, i32
  }
  func.func @transform_5(%arg0: i32) -> (i32, i32) {
    %c0_i32 = arith.constant 0 : i32
    %c0_i32_0 = arith.constant 0 : i32
    return %arg0, %c0_i32 : i32, i32
  }
}

module attributes {stable_mosaic.version = 11 : i64} {
  func.func @kernel(%arg0: i32, %arg1: memref<4x8xf32, #tpu.memory_space<vmem>>, %arg2: memref<4x32xf32, #tpu.memory_space<vmem>>, %arg3: memref<4x32xf32, #tpu.memory_space<vmem>>, %arg4: memref<176x32xbf16, #tpu.memory_space<vmem>>, %arg5: memref<4x32xf32, #tpu.memory_space<vmem>>, %arg6: memref<4x8xf32, #tpu.memory_space<vmem>>) attributes {dimension_semantics = [#tpu.dimension_semantics<parallel>], iteration_bounds = array<i64: 1>, scalar_prefetch = 0 : i64, scratch_operands = 0 : i64, tpu.core_type = #tpu.core_type<tc>, window_params = [{transform_indices = @transform_0, window_bounds = array<i64: 4, 8>}, {transform_indices = @transform_1, window_bounds = array<i64: 4, 32>}, {transform_indices = @transform_2, window_bounds = array<i64: 4, 32>}, {pipeline_mode = #tpu.pipeline_mode<synchronous>, transform_indices = @transform_3, window_bounds = array<i64: 176, 32>}, {pipeline_mode = #tpu.pipeline_mode<synchronous>, transform_indices = @transform_4, window_bounds = array<i64: 4, 32>}, {transform_indices = @transform_5, window_bounds = array<i64: 4, 8>}]} {
    %c0 = arith.constant 0 : index
    %c0_0 = arith.constant 0 : index
    %0 = vector.load %arg1[%c0, %c0_0] : memref<4x8xf32, #tpu.memory_space<vmem>>, vector<4x8xf32>
    %c0_1 = arith.constant 0 : index
    %c0_2 = arith.constant 0 : index
    %1 = vector.load %arg2[%c0_1, %c0_2] : memref<4x32xf32, #tpu.memory_space<vmem>>, vector<4x32xf32>
    %c0_3 = arith.constant 0 : index
    %c0_4 = arith.constant 0 : index
    %2 = vector.load %arg3[%c0_3, %c0_4] : memref<4x32xf32, #tpu.memory_space<vmem>>, vector<4x32xf32>
    %3 = tpu.concatenate %0, %1, %2 in 1 : vector<4x8xf32>, vector<4x32xf32>, vector<4x32xf32> -> vector<4x72xf32>
    %4 = arith.truncf %3 : vector<4x72xf32> to vector<4x72xbf16>
    %c0_5 = arith.constant 0 : index
    %c0_6 = arith.constant 0 : index
    %5 = vector.load %arg4[%c0_5, %c0_6] : memref<176x32xbf16, #tpu.memory_space<vmem>>, vector<72x32xbf16>
    %c0_7 = arith.constant 0 : index
    %c0_8 = arith.constant 0 : index
    %6 = vector.load %arg5[%c0_7, %c0_8] : memref<4x32xf32, #tpu.memory_space<vmem>>, vector<1x32xf32>
    %cst = arith.constant dense<0.000000e+00> : vector<4x32xf32>
    %7 = tpu.matmul %4, %5, %cst {dimension_numbers = #tpu.dot_dimension_numbers<[1], [0], [0], [1], [0, 0, 1, 1], [], []>} : vector<4x72xbf16>, vector<72x32xbf16>, vector<4x32xf32> -> vector<4x32xf32>
    %8 = vector.broadcast %6 : vector<1x32xf32> to vector<4x32xf32>
    %9 = arith.addf %7, %8 : vector<4x32xf32>
    %cst_9 = arith.constant 0.000000e+00 : f32
    %10 = vector.broadcast %cst_9 : f32 to vector<4x32xf32>
    %11 = arith.cmpf ogt, %9, %10 : vector<4x32xf32>
    %cst_10 = arith.constant 2.000000e-01 : f32
    %12 = vector.broadcast %cst_10 : f32 to vector<4x32xf32>
    %13 = arith.mulf %12, %9 : vector<4x32xf32>
    %14 = arith.select %11, %9, %13 : vector<4x32xi1>, vector<4x32xf32>
    %15 = arith.truncf %14 : vector<4x32xf32> to vector<4x32xbf16>
    %c80 = arith.constant 80 : index
    %c0_11 = arith.constant 0 : index
    %16 = vector.load %arg4[%c80, %c0_11] : memref<176x32xbf16, #tpu.memory_space<vmem>>, vector<32x32xbf16>
    %c1 = arith.constant 1 : index
    %c0_12 = arith.constant 0 : index
    %17 = vector.load %arg5[%c1, %c0_12] : memref<4x32xf32, #tpu.memory_space<vmem>>, vector<1x32xf32>
    %cst_13 = arith.constant dense<0.000000e+00> : vector<4x32xf32>
    %18 = tpu.matmul %15, %16, %cst_13 {dimension_numbers = #tpu.dot_dimension_numbers<[1], [0], [0], [1], [0, 0, 1, 1], [], []>} : vector<4x32xbf16>, vector<32x32xbf16>, vector<4x32xf32> -> vector<4x32xf32>
    %19 = vector.broadcast %17 : vector<1x32xf32> to vector<4x32xf32>
    %20 = arith.addf %18, %19 : vector<4x32xf32>
    %cst_14 = arith.constant 0.000000e+00 : f32
    %21 = vector.broadcast %cst_14 : f32 to vector<4x32xf32>
    %22 = arith.cmpf ogt, %20, %21 : vector<4x32xf32>
    %cst_15 = arith.constant 2.000000e-01 : f32
    %23 = vector.broadcast %cst_15 : f32 to vector<4x32xf32>
    %24 = arith.mulf %23, %20 : vector<4x32xf32>
    %25 = arith.select %22, %20, %24 : vector<4x32xi1>, vector<4x32xf32>
    %26 = arith.truncf %25 : vector<4x32xf32> to vector<4x32xbf16>
    %c112 = arith.constant 112 : index
    %c0_16 = arith.constant 0 : index
    %27 = vector.load %arg4[%c112, %c0_16] : memref<176x32xbf16, #tpu.memory_space<vmem>>, vector<32x32xbf16>
    %c2 = arith.constant 2 : index
    %c0_17 = arith.constant 0 : index
    %28 = vector.load %arg5[%c2, %c0_17] : memref<4x32xf32, #tpu.memory_space<vmem>>, vector<1x32xf32>
    %cst_18 = arith.constant dense<0.000000e+00> : vector<4x32xf32>
    %29 = tpu.matmul %26, %27, %cst_18 {dimension_numbers = #tpu.dot_dimension_numbers<[1], [0], [0], [1], [0, 0, 1, 1], [], []>} : vector<4x32xbf16>, vector<32x32xbf16>, vector<4x32xf32> -> vector<4x32xf32>
    %30 = vector.broadcast %28 : vector<1x32xf32> to vector<4x32xf32>
    %31 = arith.addf %29, %30 : vector<4x32xf32>
    %cst_19 = arith.constant 0.000000e+00 : f32
    %32 = vector.broadcast %cst_19 : f32 to vector<4x32xf32>
    %33 = arith.cmpf ogt, %31, %32 : vector<4x32xf32>
    %cst_20 = arith.constant 2.000000e-01 : f32
    %34 = vector.broadcast %cst_20 : f32 to vector<4x32xf32>
    %35 = arith.mulf %34, %31 : vector<4x32xf32>
    %36 = arith.select %33, %31, %35 : vector<4x32xi1>, vector<4x32xf32>
    %37 = arith.truncf %36 : vector<4x32xf32> to vector<4x32xbf16>
    %c144 = arith.constant 144 : index
    %c0_21 = arith.constant 0 : index
    %38 = vector.load %arg4[%c144, %c0_21] : memref<176x32xbf16, #tpu.memory_space<vmem>>, vector<32x8xbf16>
    %c3 = arith.constant 3 : index
    %c0_22 = arith.constant 0 : index
    %39 = vector.load %arg5[%c3, %c0_22] : memref<4x32xf32, #tpu.memory_space<vmem>>, vector<1x8xf32>
    %cst_23 = arith.constant dense<0.000000e+00> : vector<4x8xf32>
    %40 = tpu.matmul %37, %38, %cst_23 {dimension_numbers = #tpu.dot_dimension_numbers<[1], [0], [0], [1], [0, 0, 1, 1], [], []>} : vector<4x32xbf16>, vector<32x8xbf16>, vector<4x8xf32> -> vector<4x8xf32>
    %41 = vector.broadcast %39 : vector<1x8xf32> to vector<4x8xf32>
    %42 = arith.addf %40, %41 : vector<4x8xf32>
    %c0_24 = arith.constant 0 : index
    %c0_25 = arith.constant 0 : index
    %43 = vector.load %arg6[%c0_24, %c0_25] : memref<4x8xf32, #tpu.memory_space<vmem>>, vector<4x8xf32>
    tpu.vector_store %arg6[%c0_24, %c0_25], %42 {strides = array<i32>} : memref<4x8xf32, #tpu.memory_space<vmem>>, vector<4x8xf32>,
    return
  }
  func.func @transform_0(%arg0: i32) -> (i32, i32) {
    %c0_i32 = arith.constant 0 : i32
    %c0_i32_0 = arith.constant 0 : i32
    return %arg0, %c0_i32 : i32, i32
  }
  func.func @transform_1(%arg0: i32) -> (i32, i32) {
    %c0_i32 = arith.constant 0 : i32
    %c0_i32_0 = arith.constant 0 : i32
    return %arg0, %c0_i32 : i32, i32
  }
  func.func @transform_2(%arg0: i32) -> (i32, i32) {
    %c0_i32 = arith.constant 0 : i32
    %c0_i32_0 = arith.constant 0 : i32
    return %arg0, %c0_i32 : i32, i32
  }
  func.func @transform_3(%arg0: i32) -> (i32, i32) {
    %c0_i32 = arith.constant 0 : i32
    %c0_i32_0 = arith.constant 0 : i32
    %c0_i32_1 = arith.constant 0 : i32
    return %c0_i32, %c0_i32_0 : i32, i32
  }
  func.func @transform_4(%arg0: i32) -> (i32, i32) {
    %c0_i32 = arith.constant 0 : i32
    %c0_i32_0 = arith.constant 0 : i32
    %c0_i32_1 = arith.constant 0 : i32
    return %c0_i32, %c0_i32_0 : i32, i32
  }
  func.func @transform_5(%arg0: i32) -> (i32, i32) {
    %c0_i32 = arith.constant 0 : i32
    %c0_i32_0 = arith.constant 0 : i32
    return %arg0, %c0_i32 : i32, i32
  }
}

module attributes {stable_mosaic.version = 11 : i64} {
  func.func @kernel(%arg0: i32, %arg1: memref<16x8xf32, #tpu.memory_space<vmem>>, %arg2: memref<16x8xf32, #tpu.memory_space<vmem>>, %arg3: memref<16x4xf32, #tpu.memory_space<vmem>>, %arg4: memref<160x32xbf16, #tpu.memory_space<vmem>>, %arg5: memref<5x32xf32, #tpu.memory_space<vmem>>, %arg6: memref<16x8xf32, #tpu.memory_space<vmem>>) attributes {dimension_semantics = [#tpu.dimension_semantics<parallel>], iteration_bounds = array<i64: 2>, scalar_prefetch = 0 : i64, scratch_operands = 0 : i64, tpu.core_type = #tpu.core_type<tc>, window_params = [{transform_indices = @transform_0, window_bounds = array<i64: 16, 8>}, {transform_indices = @transform_1, window_bounds = array<i64: 16, 8>}, {transform_indices = @transform_2, window_bounds = array<i64: 16, 4>}, {pipeline_mode = #tpu.pipeline_mode<synchronous>, transform_indices = @transform_3, window_bounds = array<i64: 160, 32>}, {pipeline_mode = #tpu.pipeline_mode<synchronous>, transform_indices = @transform_4, window_bounds = array<i64: 5, 32>}, {transform_indices = @transform_5, window_bounds = array<i64: 16, 8>}]} {
    %c0 = arith.constant 0 : index
    %c0_0 = arith.constant 0 : index
    %0 = vector.load %arg1[%c0, %c0_0] : memref<16x8xf32, #tpu.memory_space<vmem>>, vector<16x8xf32>
    %c0_1 = arith.constant 0 : index
    %c0_2 = arith.constant 0 : index
    %1 = vector.load %arg2[%c0_1, %c0_2] : memref<16x8xf32, #tpu.memory_space<vmem>>, vector<16x8xf32>
    %c0_3 = arith.constant 0 : index
    %c0_4 = arith.constant 0 : index
    %2 = vector.load %arg3[%c0_3, %c0_4] : memref<16x4xf32, #tpu.memory_space<vmem>>, vector<16x4xf32>
    %3 = tpu.concatenate %0, %1, %2 in 1 : vector<16x8xf32>, vector<16x8xf32>, vector<16x4xf32> -> vector<16x20xf32>
    %4 = arith.truncf %3 : vector<16x20xf32> to vector<16x20xbf16>
    %c0_5 = arith.constant 0 : index
    %c0_6 = arith.constant 0 : index
    %5 = vector.load %arg4[%c0_5, %c0_6] : memref<160x32xbf16, #tpu.memory_space<vmem>>, vector<20x32xbf16>
    %c0_7 = arith.constant 0 : index
    %c0_8 = arith.constant 0 : index
    %6 = vector.load %arg5[%c0_7, %c0_8] : memref<5x32xf32, #tpu.memory_space<vmem>>, vector<1x32xf32>
    %cst = arith.constant dense<0.000000e+00> : vector<16x32xf32>
    %7 = tpu.matmul %4, %5, %cst {dimension_numbers = #tpu.dot_dimension_numbers<[1], [0], [0], [1], [0, 0, 1, 1], [], []>} : vector<16x20xbf16>, vector<20x32xbf16>, vector<16x32xf32> -> vector<16x32xf32>
    %8 = vector.broadcast %6 : vector<1x32xf32> to vector<16x32xf32>
    %9 = arith.addf %7, %8 : vector<16x32xf32>
    %cst_9 = arith.constant 0.000000e+00 : f32
    %10 = vector.broadcast %cst_9 : f32 to vector<16x32xf32>
    %11 = arith.cmpf ogt, %9, %10 : vector<16x32xf32>
    %cst_10 = arith.constant 2.000000e-01 : f32
    %12 = vector.broadcast %cst_10 : f32 to vector<16x32xf32>
    %13 = arith.mulf %12, %9 : vector<16x32xf32>
    %14 = arith.select %11, %9, %13 : vector<16x32xi1>, vector<16x32xf32>
    %15 = arith.truncf %14 : vector<16x32xf32> to vector<16x32xbf16>
    %c32 = arith.constant 32 : index
    %c0_11 = arith.constant 0 : index
    %16 = vector.load %arg4[%c32, %c0_11] : memref<160x32xbf16, #tpu.memory_space<vmem>>, vector<32x32xbf16>
    %c1 = arith.constant 1 : index
    %c0_12 = arith.constant 0 : index
    %17 = vector.load %arg5[%c1, %c0_12] : memref<5x32xf32, #tpu.memory_space<vmem>>, vector<1x32xf32>
    %cst_13 = arith.constant dense<0.000000e+00> : vector<16x32xf32>
    %18 = tpu.matmul %15, %16, %cst_13 {dimension_numbers = #tpu.dot_dimension_numbers<[1], [0], [0], [1], [0, 0, 1, 1], [], []>} : vector<16x32xbf16>, vector<32x32xbf16>, vector<16x32xf32> -> vector<16x32xf32>
    %19 = vector.broadcast %17 : vector<1x32xf32> to vector<16x32xf32>
    %20 = arith.addf %18, %19 : vector<16x32xf32>
    %cst_14 = arith.constant 0.000000e+00 : f32
    %21 = vector.broadcast %cst_14 : f32 to vector<16x32xf32>
    %22 = arith.cmpf ogt, %20, %21 : vector<16x32xf32>
    %cst_15 = arith.constant 2.000000e-01 : f32
    %23 = vector.broadcast %cst_15 : f32 to vector<16x32xf32>
    %24 = arith.mulf %23, %20 : vector<16x32xf32>
    %25 = arith.select %22, %20, %24 : vector<16x32xi1>, vector<16x32xf32>
    %26 = arith.truncf %25 : vector<16x32xf32> to vector<16x32xbf16>
    %c64 = arith.constant 64 : index
    %c0_16 = arith.constant 0 : index
    %27 = vector.load %arg4[%c64, %c0_16] : memref<160x32xbf16, #tpu.memory_space<vmem>>, vector<32x32xbf16>
    %c2 = arith.constant 2 : index
    %c0_17 = arith.constant 0 : index
    %28 = vector.load %arg5[%c2, %c0_17] : memref<5x32xf32, #tpu.memory_space<vmem>>, vector<1x32xf32>
    %cst_18 = arith.constant dense<0.000000e+00> : vector<16x32xf32>
    %29 = tpu.matmul %26, %27, %cst_18 {dimension_numbers = #tpu.dot_dimension_numbers<[1], [0], [0], [1], [0, 0, 1, 1], [], []>} : vector<16x32xbf16>, vector<32x32xbf16>, vector<16x32xf32> -> vector<16x32xf32>
    %30 = vector.broadcast %28 : vector<1x32xf32> to vector<16x32xf32>
    %31 = arith.addf %29, %30 : vector<16x32xf32>
    %cst_19 = arith.constant 0.000000e+00 : f32
    %32 = vector.broadcast %cst_19 : f32 to vector<16x32xf32>
    %33 = arith.cmpf ogt, %31, %32 : vector<16x32xf32>
    %cst_20 = arith.constant 2.000000e-01 : f32
    %34 = vector.broadcast %cst_20 : f32 to vector<16x32xf32>
    %35 = arith.mulf %34, %31 : vector<16x32xf32>
    %36 = arith.select %33, %31, %35 : vector<16x32xi1>, vector<16x32xf32>
    %37 = arith.truncf %36 : vector<16x32xf32> to vector<16x32xbf16>
    %c96 = arith.constant 96 : index
    %c0_21 = arith.constant 0 : index
    %38 = vector.load %arg4[%c96, %c0_21] : memref<160x32xbf16, #tpu.memory_space<vmem>>, vector<32x32xbf16>
    %c3 = arith.constant 3 : index
    %c0_22 = arith.constant 0 : index
    %39 = vector.load %arg5[%c3, %c0_22] : memref<5x32xf32, #tpu.memory_space<vmem>>, vector<1x32xf32>
    %cst_23 = arith.constant dense<0.000000e+00> : vector<16x32xf32>
    %40 = tpu.matmul %37, %38, %cst_23 {dimension_numbers = #tpu.dot_dimension_numbers<[1], [0], [0], [1], [0, 0, 1, 1], [], []>} : vector<16x32xbf16>, vector<32x32xbf16>, vector<16x32xf32> -> vector<16x32xf32>
    %41 = vector.broadcast %39 : vector<1x32xf32> to vector<16x32xf32>
    %42 = arith.addf %40, %41 : vector<16x32xf32>
    %cst_24 = arith.constant 0.000000e+00 : f32
    %43 = vector.broadcast %cst_24 : f32 to vector<16x32xf32>
    %44 = arith.cmpf ogt, %42, %43 : vector<16x32xf32>
    %cst_25 = arith.constant 2.000000e-01 : f32
    %45 = vector.broadcast %cst_25 : f32 to vector<16x32xf32>
    %46 = arith.mulf %45, %42 : vector<16x32xf32>
    %47 = arith.select %44, %42, %46 : vector<16x32xi1>, vector<16x32xf32>
    %48 = arith.truncf %47 : vector<16x32xf32> to vector<16x32xbf16>
    %c128 = arith.constant 128 : index
    %c0_26 = arith.constant 0 : index
    %49 = vector.load %arg4[%c128, %c0_26] : memref<160x32xbf16, #tpu.memory_space<vmem>>, vector<32x8xbf16>
    %c4 = arith.constant 4 : index
    %c0_27 = arith.constant 0 : index
    %50 = vector.load %arg5[%c4, %c0_27] : memref<5x32xf32, #tpu.memory_space<vmem>>, vector<1x8xf32>
    %cst_28 = arith.constant dense<0.000000e+00> : vector<16x8xf32>
    %51 = tpu.matmul %48, %49, %cst_28 {dimension_numbers = #tpu.dot_dimension_numbers<[1], [0], [0], [1], [0, 0, 1, 1], [], []>} : vector<16x32xbf16>, vector<32x8xbf16>, vector<16x8xf32> -> vector<16x8xf32>
    %52 = vector.broadcast %50 : vector<1x8xf32> to vector<16x8xf32>
    %53 = arith.addf %51, %52 : vector<16x8xf32>
    %c0_29 = arith.constant 0 : index
    %c0_30 = arith.constant 0 : index
    %54 = vector.load %arg6[%c0_29, %c0_30] : memref<16x8xf32, #tpu.memory_space<vmem>>, vector<16x8xf32>
    tpu.vector_store %arg6[%c0_29, %c0_30], %53 {strides = array<i32>} : memref<16x8xf32, #tpu.memory_space<vmem>>, vector<16x8xf32>,
    return
  }
  func.func @transform_0(%arg0: i32) -> (i32, i32) {
    %c0_i32 = arith.constant 0 : i32
    %c0_i32_0 = arith.constant 0 : i32
    return %arg0, %c0_i32 : i32, i32
  }
  func.func @transform_1(%arg0: i32) -> (i32, i32) {
    %c0_i32 = arith.constant 0 : i32
    %c0_i32_0 = arith.constant 0 : i32
    return %arg0, %c0_i32 : i32, i32
  }
  func.func @transform_2(%arg0: i32) -> (i32, i32) {
    %c0_i32 = arith.constant 0 : i32
    %c0_i32_0 = arith.constant 0 : i32
    return %arg0, %c0_i32 : i32, i32
  }
  func.func @transform_3(%arg0: i32) -> (i32, i32) {
    %c0_i32 = arith.constant 0 : i32
    %c0_i32_0 = arith.constant 0 : i32
    %c0_i32_1 = arith.constant 0 : i32
    return %c0_i32, %c0_i32_0 : i32, i32
  }
  func.func @transform_4(%arg0: i32) -> (i32, i32) {
    %c0_i32 = arith.constant 0 : i32
    %c0_i32_0 = arith.constant 0 : i32
    %c0_i32_1 = arith.constant 0 : i32
    return %c0_i32, %c0_i32_0 : i32, i32
  }
  func.func @transform_5(%arg0: i32) -> (i32, i32) {
    %c0_i32 = arith.constant 0 : i32
    %c0_i32_0 = arith.constant 0 : i32
    return %arg0, %c0_i32 : i32, i32
  }
}

</mosaic_0001>

<bundles_post_ra>
// kernel: net_conv_forward.4
= control target key start
LH: loop header
LB: loop body
LE: loop exit
PB: predicated region body
PF: predicated region fallthrough
CT: control target
= control target key end

     0   :  { %s1128_s18 = smov 0   ;;  %s1130_s19 = smov 0   ;;  %s1256_s0 = inlined_call_operand.vmem [shape: f32[20,8], index: 0, kind: input, shape index: {}]   ;;  %s1257_s1 = inlined_call_operand.vmem [shape: f32[20,8], index: 1, kind: input, shape index: {}]   ;;  %s1258_s2 = inlined_call_operand.vmem [shape: f32[20,4], index: 2, kind: input, shape index: {}]   ;;  %s1259_s3 = inlined_call_operand.vmem [shape: bf16[128,65], index: 3, kind: input, shape index: {}]   ;;  %s1260_s4 = inlined_call_operand.vmem [shape: f32[4,65], index: 4, kind: input, shape index: {}]   ;;  %s1261_s5 = inlined_call_operand.vmem [shape: f32[20,64], index: 5, kind: output, shape index: {}]  }
   0x1   :  { %s1132_s20 = smov 0  }
   0x2 LB: > { %s1141_s21 = sadd.s32 4294967295, %s1061_s20   ;;  %s1143_s22 = sadd.s32 1, %s1061_s20   ;;  %s1061_s20 = sphi %s1132_s20, %s1265_s20   ;;  %s1057_s19 = sphi %s1130_s19, %s1264_s19   ;;  %s1053_s18 = sphi %s1128_s18, %s1263_s18  }
   0x3   : > { %s139_s23 = ssub.s32 %s1061_s20, %s1143_s22  ;;  %s142_s24 = sadd.s32 1, %s1057_s19 }
   0x4   : > { %p140_p0 = scmp.eq.s32.totalorder %s139_s23, 0  ;;  %p152_p1 = scmp.ne.s32.totalorder %s1057_s19, %s1053_s18 }
   0x5   : > { %p153_p2 = scmp.eq.s32.totalorder %s1141_s21, 1  ;;  %p823_p3 = scmp.ge.s32.totalorder %s1061_s20, 1 }
   0x6   : > { %s1151_s25 = scalar_select %p140_p0, %s1057_s19, %s142_s24  }
   0x7   : > { %p1153_p4 = por %p153_p2, %p152_p1  ;;  %p234_p5 = scmp.lt.s32.totalorder %s1061_s20, 3 }
   0x9   : > { %p235_p6 = pnand %p823_p3, %p234_p5 }
   0xa   : > { %s1158_s27 = sshll.u32 (!%p235_p6), %s1141_s21, 1  ;;  %s1095_s11 = smov (!%p235_p6), 8  }
   0xb   : > { %238 = sbr.rel (%p235_p6) target bundleno = 907 (0x38b), region = 40  ;;  %p288_p7 = scmp.lt.s32.totalorder (!%p235_p6), %s1158_s27, 2 }
   0xc   : > { %s1096_s12 = smov (!%p235_p6), 16  }
  0x10   : > { %s289_s28 = scalar_select %p288_p7, %s1158_s27, 2  ;;  %v362_v6 = vld [vmem:[%s1259_s3 + $0x8] sm:$0x3]  ;;  %vm378_vm0 = vcmask 1041408   ;;  %v882_v10 = vld [vmem:[%s1259_s3] sm:$0xff]  ;;  %vm353_vm1 = vcmask 64512  }
  0x11   : > { %v370_v7 = vunpack.c.l.b16 %v362_v6  ;;  %vm356_vm2 = vcmask 130048   ;;  %vm374_vm3 = vcmask 162816   ;;  %v884_v24 = vld [vmem:[%s1259_s3 + $0x18] sm:$0xff]  ;;  %v883_v25 = vld [vmem:[%s1259_s3 + $0x10] sm:$0xff]  ;;  %v995_v27 = vld [vmem:[%s1260_s4] ss:$0 sm:$0xff] }
  0x12   : > { %s826_s29 = sshll.u32 %s289_s28, 3  ;;  %431 = vmatpush.bf16.msra.mxu1 %v884_v24  ;;  %vm421_vm6 = vcmask 261120   ;;  %v886_v36 = vld [vmem:[%s1259_s3 + $0x28] sm:$0xff]  ;;  %v885_v37 = vld [vmem:[%s1259_s3 + $0x20] sm:$0xff]  ;;  %v888_v48 = vld [vmem:[%s1259_s3 + $0x38] sm:$0xff]  ;;  %v1097_v60 = vmov 64  }
  0x13   : > { %s305_s7 = scalar_lea.vmem %s1257_s1, %s826_s29  ;;  %s319_s10 = scalar_lea.vmem %s1258_s2, %s826_s29  ;;  %v372_v8 = vpack.c.b16 %v370_v7, %v370_v7  ;;  %473 = vmatpush.bf16.msra.mxu2 %v886_v36  ;;  %v996_v39 = vld [vmem:[%s1260_s4 + $0x1] ss:$0 sm:$0xff]  ;;  %515 = vmatpush.bf16.msra.mxu3 %v888_v48  ;;  %v887_v49 = vld [vmem:[%s1259_s3 + $0x30] sm:$0xff]  ;;  %v997_v51 = vld [vmem:[%s1260_s4 + $0x2] ss:$0 sm:$0xff] }
  0x14   : > { %v333_v0 = vld [vmem:[%s305_s7] sm:$0xff]  ;;  %v334_v1 = vld [vmem:[%s305_s7 + $0x8] sm:$0xff]  ;;  %s291_s23 = scalar_lea.vmem %s1256_s0, %s826_s29  ;;  %993 = vset.pattern.permute.xlu1 %v1097_v60  ;;  %994 = vset.pattern.permute.xlu0 %v1097_v60  ;;  %s280_s29 = sand.u32 1, %s1053_s18  }
  0x15   : > { %v983_v2 = vpack.i.bf16 %v334_v1, %v333_v0  ;;  %v335_v3 = vld [vmem:[%s319_s10] sm:$0xff]  ;;  %v336_v4 = vld [vmem:[%s319_s10 + $0x8] sm:$0xff]  ;;  %v380_v9 = vsel %vm378_vm0, %v372_v8, 0  ;;  %s824_s30 = sshll.u32 %s280_s29, 4  ;;  %s584_s7 = ssub.s32 (%p1153_p4), 3, %s1158_s27 }
  0x16   : > { %v988_v5 = vpack.i.bf16 %v336_v4, %v335_v3  ;;  %388 = vmatpush.bf16.msra.mxu0 %v380_v9  ;;  %v331_v14 = vld [vmem:[%s291_s23] sm:$0xff]  ;;  %v332_v15 = vld [vmem:[%s291_s23 + $0x8] sm:$0xff]  ;;  %432 = vmatpush.bf16.msra.mxu1 %v883_v25  ;;  %s1211_s6 = scalar_lea.vmem [#allocation2], %s824_s30   ;;  %s889_s8 = sshll.u32 (%p1153_p4), %s1141_s21, 4 }
  0x17   : > { %984 = vrot.lane.b32.xlu0 %v983_v2, %s1095_s11  ;;  %474 = vmatpush.bf16.msra.mxu2 %v885_v37  ;;  %v998_v61 = vld [vmem:[%s1260_s4 + $0x3] ss:$0 sm:$0xff]  ;;  %p585_p8 = scmp.lt.s32.totalorder (%p1153_p4), %s584_s7, 2  ;;  %s1222_s10 = scalar_lea.vmem (%p1153_p4), %s1261_s5, %s889_s8  }
  0x18   : > { %516 = vmatpush.bf16.msra.mxu3 %v887_v49 }
  0x1a   : > { %389 = vmatpush.bf16.msra.mxu0 %v882_v10 }
  0x1f   : > { %989 = vrot.lane.b32.xlu0 %v988_v5, %s1096_s12 }
  0x89   : > { %v985_v11 = vpop.permute.xlu0 %984 }
  0x8a   : > { %v987_v12 = vunpack.i.h.bf16 %v985_v11  ;;  %v986_v13 = vunpack.i.l.bf16 %v985_v11 }
  0x8c   : > { %v354_v19 = vsel %vm353_vm1, %v331_v14, %v986_v13  ;;  %v355_v20 = vsel %vm353_vm1, %v332_v15, %v987_v12 }
  0x91   : > { %v990_v16 = vpop.permute.xlu0 %989 }
  0x92   : > { %v992_v17 = vunpack.i.h.bf16 %v990_v16  ;;  %v991_v18 = vunpack.i.l.bf16 %v990_v16 }
  0x94   : > { %v357_v21 = vsel %vm356_vm2, %v354_v19, %v991_v18  ;;  %v358_v22 = vsel %vm356_vm2, %v355_v20, %v992_v17 }
  0x95   : > { %v359_v23 = vpack.c.bf16 %v358_v22, %v357_v21 }
  0x97   : > { %835 = vmatmul.msk.bf16.vlgmr.msra.gmra.mxu0 %vm374_vm3, %v359_v23  ;;  %vm573_vm3 = vcmask 523264  }
 0x114   : > { %v391_v26 = vpop.f32.mrf.mxu0 }
 0x115   : > { %v392_v28 = vadd.f32 %v995_v27, %v391_v26 }
 0x117   : > { %v398_v30 = vmul.f32 0.2, %v392_v28  ;;  %vm396_vm4 = vcmp.gt.f32.partialorder %v392_v28, 0.0 }
 0x119   : > { %v400_v33 = vsel %vm396_vm4, %v392_v28, %v398_v30 }
 0x11c   : > { %v393_v29 = vpop.f32.mrf.mxu0 }
 0x11d   : > { %v394_v31 = vadd.f32 %v995_v27, %v393_v29 }
 0x11f   : > { %vm397_vm5 = vcmp.gt.f32.partialorder %v394_v31, 0.0  ;;  %v399_v32 = vmul.f32 0.2, %v394_v31 }
 0x121   : > { %v401_v34 = vsel %vm397_vm5, %v394_v31, %v399_v32 }
 0x122   : > { %v402_v35 = vpack.c.bf16 %v401_v34, %v400_v33 }
 0x124   : > { %844 = vmatmul.msk.bf16.vlgmr.msra.gmra.mxu1 %vm421_vm6, %v402_v35 }
 0x1a1   : > { %v434_v38 = vpop.f32.mrf.mxu1 }
 0x1a2   : > { %v435_v40 = vadd.f32 %v996_v39, %v434_v38 }
 0x1a4   : > { %v441_v42 = vmul.f32 0.2, %v435_v40  ;;  %vm439_vm7 = vcmp.gt.f32.partialorder %v435_v40, 0.0 }
 0x1a6   : > { %v443_v45 = vsel %vm439_vm7, %v435_v40, %v441_v42 }
 0x1a9   : > { %v436_v41 = vpop.f32.mrf.mxu1 }
 0x1aa   : > { %v437_v43 = vadd.f32 %v996_v39, %v436_v41 }
 0x1ac   : > { %vm440_vm8 = vcmp.gt.f32.partialorder %v437_v43, 0.0  ;;  %v442_v44 = vmul.f32 0.2, %v437_v43 }
 0x1ae   : > { %v444_v46 = vsel %vm440_vm8, %v437_v43, %v442_v44 }
 0x1af   : > { %v445_v47 = vpack.c.bf16 %v444_v46, %v443_v45 }
 0x1b1   : > { %853 = vmatmul.msk.bf16.vlgmr.msra.gmra.mxu2 %vm421_vm6, %v445_v47 }
 0x234   : > { %v476_v50 = vpop.f32.mrf.mxu2 }
 0x235   : > { %v477_v52 = vadd.f32 %v997_v51, %v476_v50 }
 0x237   : > { %v483_v54 = vmul.f32 0.2, %v477_v52  ;;  %vm481_vm9 = vcmp.gt.f32.partialorder %v477_v52, 0.0 }
 0x239   : > { %v485_v57 = vsel %vm481_vm9, %v477_v52, %v483_v54 }
 0x23c   : > { %v478_v53 = vpop.f32.mrf.mxu2 }
 0x23d   : > { %v479_v55 = vadd.f32 %v997_v51, %v478_v53 }
 0x23f   : > { %vm482_vm10 = vcmp.gt.f32.partialorder %v479_v55, 0.0  ;;  %v484_v56 = vmul.f32 0.2, %v479_v55 }
 0x241   : > { %v486_v58 = vsel %vm482_vm10, %v479_v55, %v484_v56 }
 0x242   : > { %v487_v59 = vpack.c.bf16 %v486_v58, %v485_v57 }
 0x244   : > { %862 = vmatmul.msk.bf16.vlgmr.msra.gmra.mxu3 %vm421_vm6, %v487_v59 }
 0x2c7   : > { %v518_v62 = vpop.f32.mrf.mxu3 }
 0x2c8   : > { %v519_v63 = vadd.f32 %v998_v61, %v518_v62 }
 0x2ca   : > { %v863_v0 = vmul.f32 -1.442695, %v519_v63 }
 0x2cc   : > { %999 = vpow2.f32 %v863_v0 }
 0x2cf   : > { %v520_v1 = vpop.f32.mrf.mxu3 }
 0x2d0   : > { %v521_v2 = vadd.f32 %v998_v61, %v520_v1 }
 0x2d2   : > { %v1000_v3 = vpop.eup %999  ;;  %v864_v4 = vmul.f32 -1.442695, %v521_v2 }
 0x2d3   : > { %v529_v5 = vadd.f32 1.0, %v1000_v3 }
 0x2d4   : > { %1001 = vpow2.f32 %v864_v4 }
 0x2d5   : > { %1003 = vrcp.f32 %v529_v5  ;;  %v542_v11 = vand.u32 2147483648, %v529_v5  ;;  %v540_v13 = vand.u32 2147483647, %v529_v5  ;;  %vm536_vm12 = vweird.f32 %v529_v5 }
 0x2d7   : > { %v543_v16 = vor.u32 1.1754944e-38, %v542_v11  ;;  %vm541_vm14 = vcmp.eq.f32.partialorder %v540_v13, 8.507059e+37 }
 0x2da   : > { %v1002_v6 = vpop.eup %1001 }
 0x2db   : > { %v1004_v7 = vpop.eup %1003  ;;  %v530_v8 = vadd.f32 1.0, %v1002_v6 }
 0x2dc   : > { %v532_v9 = vmul.f32 %v1004_v7, %v529_v5  ;;  %vm537_vm11 = vweird.f32 %v1004_v7 }
 0x2dd   : > { %1005 = vrcp.f32 %v530_v8  ;;  %vm538_vm13 = vmor %vm536_vm12, %vm537_vm11  ;;  %v557_v21 = vand.u32 2147483648, %v530_v8  ;;  %v555_v23 = vand.u32 2147483647, %v530_v8  ;;  %vm551_vm0 = vweird.f32 %v530_v8 }
 0x2de   : > { %v533_v10 = vsub.f32 1.0, %v532_v9 }
 0x2df   : > { %v558_v25 = vor.u32 1.1754944e-38, %v557_v21  ;;  %vm556_vm2 = vcmp.eq.f32.partialorder %v555_v23, 8.507059e+37 }
 0x2e0   : > { %v534_v12 = vmul.f32 %v1004_v7, %v533_v10 }
 0x2e2   : > { %v535_v14 = vadd.f32 %v1004_v7, %v534_v12 }
 0x2e3   : > { %v1006_v15 = vpop.eup %1005 }
 0x2e4   : > { %v539_v17 = vsel %vm538_vm13, %v1004_v7, %v535_v14  ;;  %v547_v18 = vmul.f32 %v1006_v15, %v530_v8  ;;  %vm552_vm15 = vweird.f32 %v1006_v15 }
 0x2e5   : > { %v544_v19 = vsel %vm541_vm14, %v543_v16, %v539_v17  ;;  %vm553_vm1 = vmor %vm551_vm0, %vm552_vm15 }
 0x2e6   : > { %563 = vperm.xlu1 %993, %v544_v19   ;;  %v548_v20 = vsub.f32 1.0, %v547_v18 }
 0x2e8   : > { %v549_v22 = vmul.f32 %v1006_v15, %v548_v20 }
 0x2ea   : > { %v550_v24 = vadd.f32 %v1006_v15, %v549_v22 }
 0x2ec   : > { %v554_v26 = vsel %vm553_vm1, %v1006_v15, %v550_v24 }
 0x2ed   : > { %v559_v27 = vsel %vm556_vm2, %v558_v25, %v554_v26 }
 0x2ee   : > { %568 = vperm.xlu1 %993, %v559_v27  }
 0x358   : > { %v564_v28 = vpop.permute.xlu1 %563 }
 0x359   : > { %v571_v29 = vmul.f32 %v564_v28, %v519_v63 }
 0x35b   : > { %574 = vst.msk [vmem:[%s1211_s6] sm:$0xff] %vm573_vm3, %v571_v29 }
 0x35f   : > { %582 = sbr.rel (!%p1153_p4) target bundleno = 907 (0x38b), region = 44 }
 0x360   : > { %v569_v30 = vpop.permute.xlu1 %568 }
 0x361   : > { %v572_v31 = vmul.f32 %v569_v30, %v521_v2 }
 0x363   : > { %575 = vst.msk [vmem:[%s1211_s6 + $0x8] sm:$0xff] %vm573_vm3, %v572_v31 }
 0x364   : > { %s1267_s7 = smov (!%p585_p8, %s584_s7), 2 }
 0x365   : > { %s867_s11 = sshll.u32 %s1267_s7, 3 }
 0x366   : > { %p870_p9 = scmp.eq.s32.totalorder %s867_s11, 0 }
 0x367   : > { %s1228_s12 = sshrl.u32 (!%p870_p9), %s1267_s7, 1 }
 0x368   : > { %593 = sbr.rel (%p870_p9) target bundleno = 907 (0x38b), region = 48  ;;  %p871_p10 = scmp.le.s32.totalorder (!%p870_p9), %s1228_s12, 0 }
 0x36d   : > { %764 = sbr.rel (%p871_p10) target bundleno = 890 (0x37a), region = 130  ;;  %s1063_s21 = smov (!%p871_p10), %s1222_s10  }
 0x36e   : > { %s1067_s26 = smov (!%p871_p10), %s1211_s6   ;;  %s1071_s27 = smov (!%p871_p10), 0  }
 0x36f   : > { %s1075_s13 = smov (!%p871_p10), 0  }
 0x372 LB: >> { %v658_v32 = vld [vmem:[%s1069_s26] sm:$0xff]  ;;  %v660_v33 = vld [vmem:[%s1069_s26 + $0x8] sm:$0xff]  ;;  %s662_s14 = sadd.s32 1, %s1073_s27  ;;  %s652_s13 = sadd.s32 1, %s1077_s13   ;;  %s1077_s13 = sphi %s1075_s13, %s652_s13   ;;  %s1073_s27 = sphi %s1071_s27, %s1072_s27   ;;  %s1069_s26 = sphi %s1067_s26, %s667_s26   ;;  %s1065_s21 = sphi %s1063_s21, %s668_s21  }
 0x373   : >> { %659 = vst [vmem:[%s1065_s21] sm:$0xff] %v658_v32  ;;  %p663_p11 = scmp.ge.s32.totalorder %s662_s14, %s1228_s12  ;;  %p651_p12 = scmp.ge.s32.totalorder %s652_s13, %s1228_s12 }
 0x374   : >> { %661 = vst [vmem:[%s1065_s21 + $0x8] sm:$0xff] %v660_v33 }
 0x375   : >> { %s1269_s14 = smov (%p663_p11, %s662_s14), 0  ;;  %654 = sbr.rel (!%p651_p12) target bundleno = 882 (0x372), region = 136 }
 0x376   : >> { %s872_s15 = sshll.u32 %s1269_s14, 4  ;;  %s1072_s27 = smov %s1269_s14  }
 0x377   : >> { %s667_s26 = scalar_lea.vmem %s1211_s6, %s872_s15 [#allocation2]   ;;  %s668_s21 = scalar_lea.vmem %s1222_s10, %s872_s15  }
 0x37a PF: > { %s1238_s16 = sand.u32 1, %s1267_s7   ;;  %s890_s17 = sshll.u32 %s1228_s12, 4 }
 0x37b   : > { %s673_s20 = scalar_lea.vmem %s1211_s6, %s890_s17 [#allocation2]   ;;  %s675_s23 = scalar_lea.vmem %s1222_s10, %s890_s17  }
 0x37c   : > { %p877_p13 = scmp.le.s32.totalorder %s1238_s16, 0 }
 0x37d   : > { %s1079_s24 = smov (!%p877_p13), %s675_s23   ;;  %s1083_s28 = smov (!%p877_p13), %s673_s20  }
 0x37e   : > { %778 = sbr.rel (%p877_p13) target bundleno = 907 (0x38b), region = 141  ;;  %s1087_s29 = smov (!%p877_p13), 0  }
 0x37f   : > { %s1091_s30 = smov (!%p877_p13), 0  }
 0x383 LB: >> { %v685_v34 = vld [vmem:[%s1085_s28] sm:$0xff]  ;;  %s687_s7 = sadd.s32 1, %s1089_s29  ;;  %s679_s30 = sadd.s32 1, %s1093_s30   ;;  %s1093_s30 = sphi %s1091_s30, %s679_s30   ;;  %s1089_s29 = sphi %s1087_s29, %s1088_s29   ;;  %s1085_s28 = sphi %s1083_s28, %s692_s28   ;;  %s1081_s24 = sphi %s1079_s24, %s693_s24  }
 0x384   : >> { %686 = vst [vmem:[%s1081_s24] sm:$0xff] %v685_v34  ;;  %p688_p0 = scmp.ge.s32.totalorder %s687_s7, %s1238_s16  ;;  %p678_p1 = scmp.ge.s32.totalorder %s679_s30, %s1238_s16 }
 0x386   : >> { %s1271_s7 = smov (%p688_p0, %s687_s7), 0  ;;  %681 = sbr.rel (!%p678_p1) target bundleno = 899 (0x383), region = 147 }
 0x387   : >> { %s878_s6 = sshll.u32 %s1271_s7, 3  ;;  %s1088_s29 = smov %s1271_s7  }
 0x388   : >> { %s692_s28 = scalar_lea.vmem %s673_s20, %s878_s6 [#allocation2]   ;;  %s693_s24 = scalar_lea.vmem %s675_s23, %s878_s6  }
 0x38b PF: > { %p12_p2 = scmp.ge.s32.totalorder %s1143_s22, 4   ;;  %s1263_s18 = smov %s1057_s19 }
 0x38c   : > { %s1264_s19 = smov %s1151_s25  ;;  %s1265_s20 = smov %s1143_s22 }
 0x38d   :  { %14 = sbr.rel (!%p12_p2) target bundleno = 2 (0x2), region = 158 }

// kernel: net_conv_forward.5
= control target key start
LH: loop header
LB: loop body
LE: loop exit
PB: predicated region body
PF: predicated region fallthrough
CT: control target
= control target key end

     0   :  { %s277_s22 = smov 8   ;;  %vm79_vm0 = vcmask 1043456   ;;  %vm32_vm1 = vcmask 64512   ;;  %vm34_vm2 = vcmask 326656   ;;  %vm75_vm3 = vcmask 588800   ;;  %s369_s1 = inlined_call_operand.vmem [shape: f32[4,32], index: 1, kind: input, shape index: {}]   ;;  %s370_s3 = inlined_call_operand.vmem [shape: bf16[176,32], index: 3, kind: input, shape index: {}]   ;;  %s371_s4 = inlined_call_operand.vmem [shape: f32[4,32], index: 4, kind: input, shape index: {}]   ;;  %s372_s2 = inlined_call_operand.vmem [shape: f32[4,32], index: 2, kind: input, shape index: {}]   ;;  %s373_s0 = inlined_call_operand.vmem [shape: f32[4,8], index: 0, kind: input, shape index: {}]   ;;  %s374_s5 = inlined_call_operand.vmem [shape: f32[4,8], index: 5, kind: output, shape index: {}]  }
   0x1   :  { %v22_v0 = vld [vmem:[%s369_s1] sm:$0xf]  ;;  %v264_v6 = vld [vmem:[%s370_s3 + $0x18] sm:$0xff]  ;;  %s278_s1 = smov 40   ;;  %v263_v7 = vld [vmem:[%s370_s3 + $0x10] sm:$0xff]  ;;  %vm118_vm5 = vcmask 261120  }
   0x2   :  { %v45_v1 = vld [vmem:[%s370_s3 + $0x20] sm:$0xf]  ;;  %25 = vrot.lane.b32.xlu0 %v22_v0, %s277_s22  ;;  %v262_v8 = vld [vmem:[%s370_s3 + $0x8] sm:$0xff]  ;;  %v266_v16 = vld [vmem:[%s370_s3 + $0x30] sm:$0xff]  ;;  %vm211_vm8 = vcmask 60416  }
   0x3   :  { %v65_v2 = vunpack.c.l.b16 %v45_v1  ;;  %v23_v5 = vld [vmem:[%s372_s2] sm:$0xf]  ;;  %128 = vmatpush.bf16.msra.mxu1 %v266_v16  ;;  %v265_v17 = vld [vmem:[%s370_s3 + $0x28] sm:$0xff]  ;;  %v267_v26 = vld [vmem:[%s370_s3 + $0x38] sm:$0xff] }
   0x4   :  { %v261_v9 = vld [vmem:[%s370_s3] sm:$0xff]  ;;  %v270_v34 = vld [vmem:[%s370_s3 + $0x50] sm:$0xff]  ;;  %v269_v35 = vld [vmem:[%s370_s3 + $0x48] sm:$0xff] }
   0x5   :  { %v70_v3 = vpack.c.b16 %v65_v2, %v65_v2  ;;  %v21_v11 = vld [vmem:[%s373_s0] sm:$0xf]  ;;  %204 = vmatpush.bf16.msra.mxu3 %v270_v34 }
   0x6   :  { %v273_v18 = vld [vmem:[%s371_s4] ss:$0 sm:$0xff]  ;;  %v274_v27 = vld [vmem:[%s371_s4 + $0x1] ss:$0 sm:$0xff]  ;;  %v275_v36 = vld [vmem:[%s371_s4 + $0x2] ss:$0 sm:$0xff] }
   0x7   :  { %v81_v4 = vsel %vm79_vm0, %v70_v3, 0  ;;  %129 = vmatpush.bf16.msra.mxu1 %v265_v17  ;;  %v268_v25 = vld [vmem:[%s370_s3 + $0x40] sm:$0xff] }
   0x8   :  { %86 = vmatpush.bf16.msra.mxu0 %v81_v4  ;;  %166 = vmatpush.bf16.msra.mxu2 %v268_v25  ;;  %v276_v43 = vld [vmem:[%s371_s4 + $0x3] ss:$0 sm:$0xff] }
   0x9   :  { %205 = vmatpush.bf16.msra.mxu3 %v269_v35 }
   0xa   :  { %29 = vrot.lane.b32.xlu0 %v23_v5, %s278_s1 }
   0xc   :  { %87 = vmatpush.bf16.msra.mxu0 %v264_v6  ;;  %167 = vmatpush.bf16.msra.mxu2 %v267_v26 }
  0x10   :  { %88 = vmatpush.bf16.msra.mxu0 %v263_v7 }
  0x14   :  { %89 = vmatpush.bf16.msra.mxu0 %v262_v8 }
  0x18   :  { %90 = vmatpush.bf16.msra.mxu0 %v261_v9 }
  0x74   :  { %v26_v10 = vpop.permute.xlu0 %25 }
  0x75   :  { %v33_v12 = vsel %vm32_vm1, %v21_v11, %v26_v10 }
  0x7c   :  { %v30_v13 = vpop.permute.xlu0 %29 }
  0x7d   :  { %v35_v14 = vsel %vm34_vm2, %v33_v12, %v30_v13 }
  0x7e   :  { %v36_v15 = vpack.c.bf16 %v35_v14, %v35_v14 }
  0x80   :  { %233 = vmatmul.msk.bf16.vlgmr.msra.gmra.mxu0 %vm75_vm3, %v36_v15 }
  0xfd   :  { %v92_v19 = vpop.f32.mrf.mxu0 }
  0xfe   :  { %v93_v20 = vadd.f32 %v273_v18, %v92_v19 }
 0x100   :  { %vm96_vm4 = vcmp.gt.f32.partialorder %v93_v20, 0.0  ;;  %v97_v21 = vmul.f32 0.2, %v93_v20 }
 0x102   :  { %v98_v22 = vsel %vm96_vm4, %v93_v20, %v97_v21 }
 0x103   :  { %v99_v23 = vpack.c.bf16 %v98_v22, %v98_v22 }
 0x105   :  { %v94_v24 = vpop.f32.mrf.mxu0  ;;  %242 = vmatmul.msk.bf16.vlgmr.msra.gmra.mxu1 %vm118_vm5, %v99_v23 }
 0x182   :  { %v131_v28 = vpop.f32.mrf.mxu1 }
 0x183   :  { %v132_v29 = vadd.f32 %v274_v27, %v131_v28 }
 0x185   :  { %vm135_vm6 = vcmp.gt.f32.partialorder %v132_v29, 0.0  ;;  %v136_v30 = vmul.f32 0.2, %v132_v29 }
 0x187   :  { %v137_v31 = vsel %vm135_vm6, %v132_v29, %v136_v30 }
 0x188   :  { %v138_v32 = vpack.c.bf16 %v137_v31, %v137_v31 }
 0x18a   :  { %v133_v33 = vpop.f32.mrf.mxu1  ;;  %251 = vmatmul.msk.bf16.vlgmr.msra.gmra.mxu2 %vm118_vm5, %v138_v32 }
 0x20d   :  { %v169_v37 = vpop.f32.mrf.mxu2 }
 0x20e   :  { %v170_v38 = vadd.f32 %v275_v36, %v169_v37 }
 0x210   :  { %vm173_vm7 = vcmp.gt.f32.partialorder %v170_v38, 0.0  ;;  %v174_v39 = vmul.f32 0.2, %v170_v38 }
 0x212   :  { %v175_v40 = vsel %vm173_vm7, %v170_v38, %v174_v39 }
 0x213   :  { %v176_v41 = vpack.c.bf16 %v175_v40, %v175_v40 }
 0x215   :  { %v171_v42 = vpop.f32.mrf.mxu2  ;;  %260 = vmatmul.msk.bf16.vlgmr.msra.gmra.mxu3 %vm118_vm5, %v176_v41 }
 0x298   :  { %v207_v44 = vpop.f32.mrf.mxu3 }
 0x299   :  { %v208_v45 = vadd.f32 %v276_v43, %v207_v44 }
 0x29b   :  { %212 = vst.msk [vmem:[%s374_s5] sm:$0xf] %vm211_vm8, %v208_v45 }
 0x2a0   :  { %v209_v46 = vpop.f32.mrf.mxu3 }

// kernel: net_conv_forward.3
= control target key start
LH: loop header
LB: loop body
LE: loop exit
PB: predicated region body
PF: predicated region fallthrough
CT: control target
= control target key end

     0   :  { %s1117_s18 = smov 0   ;;  %s1119_s19 = smov 0   ;;  %s1259_s0 = inlined_call_operand.vmem [shape: f32[20,8], index: 0, kind: input, shape index: {}]   ;;  %s1260_s1 = inlined_call_operand.vmem [shape: f32[20,8], index: 1, kind: input, shape index: {}]   ;;  %s1261_s2 = inlined_call_operand.vmem [shape: f32[20,4], index: 2, kind: input, shape index: {}]   ;;  %s1262_s3 = inlined_call_operand.vmem [shape: bf16[160,32], index: 3, kind: input, shape index: {}]   ;;  %s1263_s4 = inlined_call_operand.vmem [shape: f32[5,32], index: 4, kind: input, shape index: {}]   ;;  %s1264_s5 = inlined_call_operand.vmem [shape: f32[20,8], index: 5, kind: output, shape index: {}]  }
   0x1   :  { %s1121_s20 = smov 0  }
   0x2 LB: > { %s1130_s21 = sadd.s32 4294967295, %s1051_s20   ;;  %s1132_s22 = sadd.s32 1, %s1051_s20   ;;  %s1051_s20 = sphi %s1121_s20, %s1268_s20   ;;  %s1047_s19 = sphi %s1119_s19, %s1267_s19   ;;  %s1043_s18 = sphi %s1117_s18, %s1266_s18  }
   0x3   : > { %s139_s23 = ssub.s32 %s1051_s20, %s1132_s22  ;;  %s142_s24 = sadd.s32 1, %s1047_s19 }
   0x4   : > { %p140_p0 = scmp.eq.s32.totalorder %s139_s23, 0  ;;  %p152_p1 = scmp.ne.s32.totalorder %s1047_s19, %s1043_s18 }
   0x5   : > { %p153_p2 = scmp.eq.s32.totalorder %s1130_s21, 1  ;;  %p814_p3 = scmp.ge.s32.totalorder %s1051_s20, 1 }
   0x6   : > { %s1140_s25 = scalar_select %p140_p0, %s1047_s19, %s142_s24  }
   0x7   : > { %p1142_p4 = por %p153_p2, %p152_p1  ;;  %p234_p5 = scmp.lt.s32.totalorder %s1051_s20, 3 }
   0x9   : > { %p235_p6 = pnand %p814_p3, %p234_p5 }
   0xa   : > { %s1147_s27 = sshll.u32 (!%p235_p6), %s1130_s21, 1  ;;  %s1085_s11 = smov (!%p235_p6), 8  }
   0xb   : > { %238 = sbr.rel (%p235_p6) target bundleno = 903 (0x387), region = 40  ;;  %p288_p7 = scmp.lt.s32.totalorder (!%p235_p6), %s1147_s27, 2 }
   0xc   : > { %s1086_s12 = smov (!%p235_p6), 16   ;;  %s280_s8 = sand.u32 (!%p235_p6), 1, %s1043_s18  }
   0xd   : > { %s815_s9 = sshll.u32 (!%p235_p6), %s280_s8, 4 }
  0x10   : > { %s289_s28 = scalar_select %p288_p7, %s1147_s27, 2  ;;  %v362_v6 = vld [vmem:[%s1262_s3 + $0x8] sm:$0x3]  ;;  %vm378_vm0 = vcmask 1041408   ;;  %v880_v10 = vld [vmem:[%s1262_s3] sm:$0xff]  ;;  %vm353_vm1 = vcmask 64512  }
  0x11   : > { %v370_v7 = vunpack.c.l.b16 %v362_v6  ;;  %vm356_vm2 = vcmask 130048   ;;  %vm374_vm3 = vcmask 162816   ;;  %v882_v24 = vld [vmem:[%s1262_s3 + $0x18] sm:$0xff]  ;;  %v881_v25 = vld [vmem:[%s1262_s3 + $0x10] sm:$0xff]  ;;  %v992_v27 = vld [vmem:[%s1263_s4] ss:$0 sm:$0xff] }
  0x12   : > { %s817_s29 = sshll.u32 %s289_s28, 3  ;;  %431 = vmatpush.bf16.msra.mxu1 %v882_v24  ;;  %vm421_vm6 = vcmask 261120   ;;  %v884_v36 = vld [vmem:[%s1262_s3 + $0x28] sm:$0xff]  ;;  %v883_v37 = vld [vmem:[%s1262_s3 + $0x20] sm:$0xff]  ;;  %v886_v48 = vld [vmem:[%s1262_s3 + $0x38] sm:$0xff]  ;;  %s575_s18 = ssub.s32 (%p1142_p4), 3, %s1147_s27 }
  0x13   : > { %s305_s7 = scalar_lea.vmem %s1260_s1, %s817_s29  ;;  %s319_s10 = scalar_lea.vmem %s1261_s2, %s817_s29  ;;  %v372_v8 = vpack.c.b16 %v370_v7, %v370_v7  ;;  %473 = vmatpush.bf16.msra.mxu2 %v884_v36  ;;  %v993_v39 = vld [vmem:[%s1263_s4 + $0x1] ss:$0 sm:$0xff]  ;;  %515 = vmatpush.bf16.msra.mxu3 %v886_v48  ;;  %v885_v49 = vld [vmem:[%s1262_s3 + $0x30] sm:$0xff]  ;;  %v994_v51 = vld [vmem:[%s1263_s4 + $0x2] ss:$0 sm:$0xff] }
  0x14   : > { %v333_v0 = vld [vmem:[%s305_s7] sm:$0xff]  ;;  %v334_v1 = vld [vmem:[%s305_s7 + $0x8] sm:$0xff]  ;;  %s291_s23 = scalar_lea.vmem %s1259_s0, %s817_s29  ;;  %s889_s13 = sshll.u32 (%p1142_p4), %s1130_s21, 4 }
  0x15   : > { %v982_v2 = vpack.i.bf16 %v334_v1, %v333_v0  ;;  %v335_v3 = vld [vmem:[%s319_s10] sm:$0xff]  ;;  %v336_v4 = vld [vmem:[%s319_s10 + $0x8] sm:$0xff]  ;;  %v380_v9 = vsel %vm378_vm0, %v372_v8, 0  ;;  %p576_p8 = scmp.lt.s32.totalorder (%p1142_p4), %s575_s18, 2  ;;  %s1225_s16 = scalar_lea.vmem (%p1142_p4), %s1264_s5, %s889_s13  }
  0x16   : > { %v987_v5 = vpack.i.bf16 %v336_v4, %v335_v3  ;;  %388 = vmatpush.bf16.msra.mxu0 %v380_v9  ;;  %v331_v14 = vld [vmem:[%s291_s23] sm:$0xff]  ;;  %v332_v15 = vld [vmem:[%s291_s23 + $0x8] sm:$0xff]  ;;  %432 = vmatpush.bf16.msra.mxu1 %v881_v25 }
  0x17   : > { %983 = vrot.lane.b32.xlu0 %v982_v2, %s1085_s11  ;;  %474 = vmatpush.bf16.msra.mxu2 %v883_v37  ;;  %v888_v60 = vld [vmem:[%s1262_s3 + $0x48] sm:$0xff]  ;;  %v887_v61 = vld [vmem:[%s1262_s3 + $0x40] sm:$0xff] }
  0x18   : > { %516 = vmatpush.bf16.msra.mxu3 %v885_v49  ;;  %v995_v63 = vld [vmem:[%s1263_s4 + $0x3] ss:$0 sm:$0xff]  ;;  %v996_v8 = vld [vmem:[%s1263_s4 + $0x4] ss:$0 sm:$0xff] }
  0x1a   : > { %389 = vmatpush.bf16.msra.mxu0 %v880_v10 }
  0x1e   : > { %557 = vmatpush.bf16.msrb.mxu0 %v888_v60 }
  0x1f   : > { %988 = vrot.lane.b32.xlu0 %v987_v5, %s1086_s12  ;;  %s1212_s12 = scalar_lea.vmem [#allocation2], %s815_s9  }
  0x22   : > { %558 = vmatpush.bf16.msrb.mxu0 %v887_v61 }
  0x89   : > { %v984_v11 = vpop.permute.xlu0 %983 }
  0x8a   : > { %v986_v12 = vunpack.i.h.bf16 %v984_v11  ;;  %v985_v13 = vunpack.i.l.bf16 %v984_v11 }
  0x8c   : > { %v354_v19 = vsel %vm353_vm1, %v331_v14, %v985_v13  ;;  %v355_v20 = vsel %vm353_vm1, %v332_v15, %v986_v12 }
  0x91   : > { %v989_v16 = vpop.permute.xlu0 %988 }
  0x92   : > { %v991_v17 = vunpack.i.h.bf16 %v989_v16  ;;  %v990_v18 = vunpack.i.l.bf16 %v989_v16 }
  0x94   : > { %v357_v21 = vsel %vm356_vm2, %v354_v19, %v990_v18  ;;  %v358_v22 = vsel %vm356_vm2, %v355_v20, %v991_v17 }
  0x95   : > { %v359_v23 = vpack.c.bf16 %v358_v22, %v357_v21 }
  0x97   : > { %826 = vmatmul.msk.bf16.vlgmr.msra.gmra.mxu0 %vm374_vm3, %v359_v23 }
 0x114   : > { %v391_v26 = vpop.f32.mrf.mxu0 }
 0x115   : > { %v392_v28 = vadd.f32 %v992_v27, %v391_v26 }
 0x117   : > { %v398_v30 = vmul.f32 0.2, %v392_v28  ;;  %vm396_vm4 = vcmp.gt.f32.partialorder %v392_v28, 0.0 }
 0x119   : > { %v400_v33 = vsel %vm396_vm4, %v392_v28, %v398_v30 }
 0x11c   : > { %v393_v29 = vpop.f32.mrf.mxu0 }
 0x11d   : > { %v394_v31 = vadd.f32 %v992_v27, %v393_v29 }
 0x11f   : > { %vm397_vm5 = vcmp.gt.f32.partialorder %v394_v31, 0.0  ;;  %v399_v32 = vmul.f32 0.2, %v394_v31 }
 0x121   : > { %v401_v34 = vsel %vm397_vm5, %v394_v31, %v399_v32 }
 0x122   : > { %v402_v35 = vpack.c.bf16 %v401_v34, %v400_v33 }
 0x124   : > { %835 = vmatmul.msk.bf16.vlgmr.msra.gmra.mxu1 %vm421_vm6, %v402_v35 }
 0x1a1   : > { %v434_v38 = vpop.f32.mrf.mxu1 }
 0x1a2   : > { %v435_v40 = vadd.f32 %v993_v39, %v434_v38 }
 0x1a4   : > { %v441_v42 = vmul.f32 0.2, %v435_v40  ;;  %vm439_vm7 = vcmp.gt.f32.partialorder %v435_v40, 0.0 }
 0x1a6   : > { %v443_v45 = vsel %vm439_vm7, %v435_v40, %v441_v42 }
 0x1a9   : > { %v436_v41 = vpop.f32.mrf.mxu1 }
 0x1aa   : > { %v437_v43 = vadd.f32 %v993_v39, %v436_v41 }
 0x1ac   : > { %vm440_vm8 = vcmp.gt.f32.partialorder %v437_v43, 0.0  ;;  %v442_v44 = vmul.f32 0.2, %v437_v43 }
 0x1ae   : > { %v444_v46 = vsel %vm440_vm8, %v437_v43, %v442_v44 }
 0x1af   : > { %v445_v47 = vpack.c.bf16 %v444_v46, %v443_v45 }
 0x1b1   : > { %844 = vmatmul.msk.bf16.vlgmr.msra.gmra.mxu2 %vm421_vm6, %v445_v47 }
 0x234   : > { %v476_v50 = vpop.f32.mrf.mxu2 }
 0x235   : > { %v477_v52 = vadd.f32 %v994_v51, %v476_v50 }
 0x237   : > { %v483_v54 = vmul.f32 0.2, %v477_v52  ;;  %vm481_vm9 = vcmp.gt.f32.partialorder %v477_v52, 0.0 }
 0x239   : > { %v485_v57 = vsel %vm481_vm9, %v477_v52, %v483_v54 }
 0x23c   : > { %v478_v53 = vpop.f32.mrf.mxu2 }
 0x23d   : > { %v479_v55 = vadd.f32 %v994_v51, %v478_v53 }
 0x23f   : > { %vm482_vm10 = vcmp.gt.f32.partialorder %v479_v55, 0.0  ;;  %v484_v56 = vmul.f32 0.2, %v479_v55 }
 0x241   : > { %v486_v58 = vsel %vm482_vm10, %v479_v55, %v484_v56 }
 0x242   : > { %v487_v59 = vpack.c.bf16 %v486_v58, %v485_v57 }
 0x244   : > { %853 = vmatmul.msk.bf16.vlgmr.msra.gmra.mxu3 %vm421_vm6, %v487_v59 }
 0x2c7   : > { %v518_v62 = vpop.f32.mrf.mxu3 }
 0x2c8   : > { %v519_v0 = vadd.f32 %v995_v63, %v518_v62 }
 0x2ca   : > { %v525_v2 = vmul.f32 0.2, %v519_v0  ;;  %vm523_vm11 = vcmp.gt.f32.partialorder %v519_v0, 0.0 }
 0x2cc   : > { %v527_v5 = vsel %vm523_vm11, %v519_v0, %v525_v2 }
 0x2cf   : > { %v520_v1 = vpop.f32.mrf.mxu3 }
 0x2d0   : > { %v521_v3 = vadd.f32 %v995_v63, %v520_v1 }
 0x2d2   : > { %vm524_vm12 = vcmp.gt.f32.partialorder %v521_v3, 0.0  ;;  %v526_v4 = vmul.f32 0.2, %v521_v3 }
 0x2d4   : > { %v528_v6 = vsel %vm524_vm12, %v521_v3, %v526_v4 }
 0x2d5   : > { %v529_v7 = vpack.c.bf16 %v528_v6, %v527_v5 }
 0x2d7   : > { %862 = vmatmul.msk.bf16.vlgmr.msrb.gmra.mxu0 %vm421_vm6, %v529_v7 }
 0x354   : > { %v560_v9 = vpop.f32.mrf.mxu0 }
 0x355   : > { %v561_v10 = vadd.f32 %v996_v8, %v560_v9 }
 0x357   : > { %565 = vst.msk [vmem:[%s1212_s12] sm:$0xff] %vm353_vm1, %v561_v10 }
 0x35b   : > { %573 = sbr.rel (!%p1142_p4) target bundleno = 903 (0x387), region = 44 }
 0x35c   : > { %v562_v11 = vpop.f32.mrf.mxu0 }
 0x35d   : > { %v563_v12 = vadd.f32 %v996_v8, %v562_v11 }
 0x35f   : > { %566 = vst.msk [vmem:[%s1212_s12 + $0x8] sm:$0xff] %vm353_vm1, %v563_v12 }
 0x360   : > { %s1270_s18 = smov (!%p576_p8, %s575_s18), 2 }
 0x361   : > { %s865_s17 = sshll.u32 %s1270_s18, 3 }
 0x362   : > { %p868_p9 = scmp.eq.s32.totalorder %s865_s17, 0 }
 0x363   : > { %s1231_s20 = sshrl.u32 (!%p868_p9), %s1270_s18, 1 }
 0x364   : > { %584 = sbr.rel (%p868_p9) target bundleno = 903 (0x387), region = 48  ;;  %p869_p10 = scmp.le.s32.totalorder (!%p868_p9), %s1231_s20, 0 }
 0x369   : > { %755 = sbr.rel (%p869_p10) target bundleno = 886 (0x376), region = 130  ;;  %s1053_s21 = smov (!%p869_p10), %s1225_s16  }
 0x36a   : > { %s1057_s26 = smov (!%p869_p10), %s1212_s12   ;;  %s1061_s27 = smov (!%p869_p10), 0  }
 0x36b   : > { %s1065_s23 = smov (!%p869_p10), 0  }
 0x36e LB: >> { %v649_v13 = vld [vmem:[%s1059_s26] sm:$0xff]  ;;  %v651_v14 = vld [vmem:[%s1059_s26 + $0x8] sm:$0xff]  ;;  %s653_s24 = sadd.s32 1, %s1063_s27  ;;  %s643_s23 = sadd.s32 1, %s1067_s23   ;;  %s1067_s23 = sphi %s1065_s23, %s643_s23   ;;  %s1063_s27 = sphi %s1061_s27, %s1062_s27   ;;  %s1059_s26 = sphi %s1057_s26, %s658_s26   ;;  %s1055_s21 = sphi %s1053_s21, %s659_s21  }
 0x36f   : >> { %650 = vst [vmem:[%s1055_s21] sm:$0xff] %v649_v13  ;;  %p654_p11 = scmp.ge.s32.totalorder %s653_s24, %s1231_s20  ;;  %p642_p12 = scmp.ge.s32.totalorder %s643_s23, %s1231_s20 }
 0x370   : >> { %652 = vst [vmem:[%s1055_s21 + $0x8] sm:$0xff] %v651_v14 }
 0x371   : >> { %s1272_s24 = smov (%p654_p11, %s653_s24), 0  ;;  %645 = sbr.rel (!%p642_p12) target bundleno = 878 (0x36e), region = 136 }
 0x372   : >> { %s870_s28 = sshll.u32 %s1272_s24, 4  ;;  %s1062_s27 = smov %s1272_s24  }
 0x373   : >> { %s658_s26 = scalar_lea.vmem %s1212_s12, %s870_s28 [#allocation2]   ;;  %s659_s21 = scalar_lea.vmem %s1225_s16, %s870_s28  }
 0x376 PF: > { %s1241_s29 = sand.u32 1, %s1270_s18   ;;  %s890_s30 = sshll.u32 %s1231_s20, 4 }
 0x377   : > { %s664_s6 = scalar_lea.vmem %s1212_s12, %s890_s30 [#allocation2]   ;;  %s666_s7 = scalar_lea.vmem %s1225_s16, %s890_s30  }
 0x378   : > { %p875_p13 = scmp.le.s32.totalorder %s1241_s29, 0 }
 0x379   : > { %s1069_s8 = smov (!%p875_p13), %s666_s7   ;;  %s1073_s9 = smov (!%p875_p13), %s664_s6  }
 0x37a   : > { %769 = sbr.rel (%p875_p13) target bundleno = 903 (0x387), region = 141  ;;  %s1077_s10 = smov (!%p875_p13), 0  }
 0x37b   : > { %s1081_s11 = smov (!%p875_p13), 0  }
 0x37f LB: >> { %v676_v15 = vld [vmem:[%s1075_s9] sm:$0xff]  ;;  %s678_s18 = sadd.s32 1, %s1079_s10  ;;  %s670_s11 = sadd.s32 1, %s1083_s11   ;;  %s1083_s11 = sphi %s1081_s11, %s670_s11   ;;  %s1079_s10 = sphi %s1077_s10, %s1078_s10   ;;  %s1075_s9 = sphi %s1073_s9, %s683_s9   ;;  %s1071_s8 = sphi %s1069_s8, %s684_s8  }
 0x380   : >> { %677 = vst [vmem:[%s1071_s8] sm:$0xff] %v676_v15  ;;  %p679_p0 = scmp.ge.s32.totalorder %s678_s18, %s1241_s29  ;;  %p669_p1 = scmp.ge.s32.totalorder %s670_s11, %s1241_s29 }
 0x382   : >> { %s1274_s18 = smov (%p679_p0, %s678_s18), 0  ;;  %672 = sbr.rel (!%p669_p1) target bundleno = 895 (0x37f), region = 147 }
 0x383   : >> { %s876_s12 = sshll.u32 %s1274_s18, 3  ;;  %s1078_s10 = smov %s1274_s18  }
 0x384   : >> { %s683_s9 = scalar_lea.vmem %s664_s6, %s876_s12 [#allocation2]   ;;  %s684_s8 = scalar_lea.vmem %s666_s7, %s876_s12  }
 0x387 PF: > { %p12_p2 = scmp.ge.s32.totalorder %s1132_s22, 4   ;;  %s1266_s18 = smov %s1047_s19 }
 0x388   : > { %s1267_s19 = smov %s1140_s25  ;;  %s1268_s20 = smov %s1132_s22 }
 0x389   :  { %14 = sbr.rel (!%p12_p2) target bundleno = 2 (0x2), region = 158 }

</bundles_post_ra>
